<compile_context>
chip_gen: v7x
topology: tpu7x:2x2x1
jax: 0.10.0
libtpu: 0.0.40
codegen_flags: <defaults>
</compile_context>

<pallas_src>
import functools

import jax
import jax.numpy as jnp
from jax.experimental import pallas as pl
from jax.experimental.pallas import tpu as pltpu

EPS = 1e-5
LANE = 128
SUBLANE = 8


def _round_up(x, m):
    return (x + m - 1) // m * m


def conv_stats_kernel(p_ref, w_ref, sum_ref, ssq_ref):
    # Pass 1: conv tile on the MXU (bf16 in, f32 accumulate), then per-channel sum / sumsq
    # accumulated into this core's resident (8, Cp) block (same block across the tile axis).
    y = jnp.dot(p_ref[...], w_ref[...], preferred_element_type=jnp.float32)

    @pl.when(pl.program_id(1) == 0)
    def _():
        sum_ref[...] = jnp.zeros_like(sum_ref)
        ssq_ref[...] = jnp.zeros_like(ssq_ref)

    # Cross-sublane reduce (XLU has slack in a memory-bound kernel); broadcast across the
    # 8 sublanes so the accumulator store stays a full aligned (8, Cp) tile.
    s = jnp.sum(y, axis=0, keepdims=True)
    q = jnp.sum(y * y, axis=0, keepdims=True)
    sum_ref[...] += jnp.broadcast_to(s, sum_ref.shape)
    ssq_ref[...] += jnp.broadcast_to(q, ssq_ref.shape)


def conv_affine_relu_kernel(p_ref, w_ref, scale_ref, shift_ref, o_ref):
    # Pass 2: recompute conv tile + fused BatchNorm affine + ReLU. Epilogue math stays f32 on
    # the f32 accumulator (v5e has no bf16 VPU); single cast at the lane-dense bf16 store.
    y = jnp.dot(p_ref[...], w_ref[...], preferred_element_type=jnp.float32)
    o_ref[...] = jnp.maximum(y * scale_ref[...] + shift_ref[...], 0.0).astype(o_ref.dtype)


def im2col_nhwc(x_nhwc, kh, kw, pad):
    # TODO(synk): fuse this into the kernel (halo blocks) to cut the 9x activation HBM blow-up.
    n, h, w, c = x_nhwc.shape
    xp = jnp.pad(x_nhwc, ((0, 0), (pad, pad), (pad, pad), (0, 0)))
    cols = []
    for dy in range(kh):
        for dx in range(kw):
            cols.append(xp[:, dy:dy + h, dx:dx + w, :])  # (N,H,W,C)
    patches = jnp.concatenate(cols, axis=-1)             # (N,H,W,KH*KW*C)
    return patches.reshape(n * h * w, kh * kw * c)


@functools.partial(jax.jit, static_argnums=(4, 5, 6))
def generic_conv_forward(x_nchw, weight, gamma, beta, kernel_size=3, padding=1, tile_m=1024):
    # x_nchw: (N, Cin, H, W); weight: (Cout, Cin, KH, KW) — PyTorch conventions.
    n, cin, h, w = x_nchw.shape
    cout = weight.shape[0]
    kh = kw = kernel_size
    kdim = kh * kw * cin
    m = n * h * w

    # bf16 for the twice-read im2col stream; f32 accumulation is kept in-kernel.
    compute_dtype = jnp.bfloat16

    # ---- wrapper-side im2col (XLA-fused) ----
    # TODO(synk): skip the NCHW->NHWC transpose if the producer can emit NHWC directly.
    x_nhwc = jnp.transpose(x_nchw, (0, 2, 3, 1))
    patches = im2col_nhwc(x_nhwc, kh, kw, padding).astype(compute_dtype)   # (M, K) bf16

    # ---- tiling / padding for lane-dense, pipelined kernels ----
    tile_m = min(_round_up(tile_m, LANE), _round_up(m, LANE))   # multiple of 128
    m_tiles = -(-m // tile_m)

    # Split pass-1's resident accumulator across v7x's two TensorCores when there is enough
    # work; each core owns its own (8, Cp) partial block. Harmless on single-TC v5e/v6e.
    core_split = 2 if m_tiles >= 2 else 1
    tiles_per_core = -(-m_tiles // core_split)
    m_pad = core_split * tiles_per_core * tile_m
    if m_pad != m:
        # Zero rows contribute 0 to both sum and sumsq (no conv bias), so stats stay exact.
        patches = jnp.pad(patches, ((0, m_pad - m), (0, 0)))

    cp = _round_up(cout, LANE)  # lane-dense output channels
    # NOTE: do NOT pad kdim (36) to 128 in HBM — it would ~3.5x the dominant patches stream.
    w2d = jnp.transpose(weight, (2, 3, 1, 0)).reshape(kdim, cout)  # (dy,dx,cin) == im2col order
    w2d = jnp.pad(w2d, ((0, 0), (0, cp - cout))).astype(compute_dtype)

    itemsize = jnp.dtype(compute_dtype).itemsize
    flops = 2 * m_pad * kdim * cp
    p_bytes = m_pad * kdim * itemsize
    w_bytes = kdim * cp * itemsize
    vmem_limit = 32 * 1024 * 1024   # per-step footprint ~1 MiB even at tile_m=2048

    # ---- pass 1: conv + per-channel sum / sumsq (core-parallel x accumulator axis) ----
    p_spec1 = pl.BlockSpec((tile_m, kdim), lambda c, t: (c * tiles_per_core + t, 0))
    w_spec1 = pl.BlockSpec((kdim, cp), lambda c, t: (0, 0))          # grid-invariant
    acc_spec = pl.BlockSpec((SUBLANE, cp), lambda c, t: (c, 0))      # per-core resident block

    sum_pad, ssq_pad = pl.pallas_call(
        conv_stats_kernel,
        grid=(core_split, tiles_per_core),
        in_specs=[p_spec1, w_spec1],
        out_specs=(acc_spec, acc_spec),
        out_shape=(jax.ShapeDtypeStruct((core_split * SUBLANE, cp), jnp.float32),
                   jax.ShapeDtypeStruct((core_split * SUBLANE, cp), jnp.float32)),
        compiler_params=pltpu.CompilerParams(
            dimension_semantics=("parallel", "arbitrary"),
            vmem_limit_bytes=vmem_limit),
        cost_estimate=pl.CostEstimate(
            flops=flops, transcendentals=0,
            bytes_accessed=p_bytes + w_bytes + 2 * core_split * SUBLANE * cp * 4),
    )(patches, w2d)

    # Each core's block holds its partial sum replicated across 8 sublanes; take sublane 0
    # per core, combine, then fold BN (batch stats, biased var) into per-channel scale/shift.
    ch_sum = sum_pad.reshape(core_split, SUBLANE, cp)[:, 0, :].sum(axis=0)
    ch_ssq = ssq_pad.reshape(core_split, SUBLANE, cp)[:, 0, :].sum(axis=0)

    mean = ch_sum / m                                     # divide by the *real* row count
    # TODO(synk): switch to per-tile Welford combine if M grows to millions of rows
    # (E[x^2]-mean^2 can lose digits to cancellation at very large M).
    var = jnp.maximum(ch_ssq / m - mean * mean, 0.0)
    inv = jax.lax.rsqrt(var + EPS)
    gamma_p = jnp.pad(gamma.astype(jnp.float32), (0, cp - cout))
    beta_p = jnp.pad(beta.astype(jnp.float32), (0, cp - cout))
    scale = (gamma_p * inv).reshape(1, cp)
    shift = (beta_p - mean * gamma_p * inv).reshape(1, cp)

    # ---- pass 2: conv + fused scale/shift + ReLU (fully parallel over M tiles) ----
    grid2 = (m_pad // tile_m,)
    p_spec2 = pl.BlockSpec((tile_m, kdim), lambda i: (i, 0))
    w_spec2 = pl.BlockSpec((kdim, cp), lambda i: (0, 0))
    vec_spec2 = pl.BlockSpec((1, cp), lambda i: (0, 0))

    # bf16 lane-dense padded output halves the pass-2 write amplification for small Cout.
    # TODO(synk): if production Cout >= 128 (no padding) or 2*cp*bytes(y) < kdim*bytes(patches),
    #             stash the conv output in pass 1 instead of recomputing it here.
    out2d = pl.pallas_call(
        conv_affine_relu_kernel,
        grid=grid2,
        in_specs=[p_spec2, w_spec2, vec_spec2, vec_spec2],
        out_specs=pl.BlockSpec((tile_m, cp), lambda i: (i, 0)),
        out_shape=jax.ShapeDtypeStruct((m_pad, cp), jnp.bfloat16),
        compiler_params=pltpu.CompilerParams(
            dimension_semantics=("parallel",),
            vmem_limit_bytes=vmem_limit),
        cost_estimate=pl.CostEstimate(
            flops=flops, transcendentals=0,
            bytes_accessed=p_bytes + w_bytes + 2 * cp * 4 + m_pad * cp * 2),
    )(patches, w2d, scale, shift)

    # Slice + reshape + transpose + cast fuse into a single XLA copy over the padded buffer.
    out_nhwc = out2d[:m, :cout].reshape(n, h, w, cout)
    # TODO(synk): if the downstream consumer accepts NHWC (bf16), return out_nhwc directly.
    return jnp.transpose(out_nhwc, (0, 3, 1, 2)).astype(x_nchw.dtype)   # back to NCHW f32


def reference_forward(x_nchw, weight, gamma, beta, padding=1, conv_dtype=jnp.float32):
    # Pure-JAX reference. conv_dtype=bf16 mirrors the kernel's compute dtype (f32 accumulate).
    y = jax.lax.conv_general_dilated(
        x_nchw.astype(conv_dtype), weight.astype(conv_dtype),
        window_strides=(1, 1),
        padding=[(padding, padding), (padding, padding)],
        dimension_numbers=("NCHW", "OIHW", "NCHW"),
        preferred_element_type=jnp.float32)
    mean = jnp.mean(y, axis=(0, 2, 3), keepdims=True)
    var = jnp.mean((y - mean) ** 2, axis=(0, 2, 3), keepdims=True)
    yhat = (y - mean) * jax.lax.rsqrt(var + EPS)
    yhat = yhat * gamma.reshape(1, -1, 1, 1) + beta.reshape(1, -1, 1, 1)
    return jnp.maximum(yhat, 0.0)


if __name__ == "__main__":
    key = jax.random.PRNGKey(0)
    k_x, k_w = jax.random.split(key)

    N, Cin, H, W = 2, 4, 16, 16
    Cout, K, PAD = 8, 3, 1

    x = jax.random.normal(k_x, (N, Cin, H, W), dtype=jnp.float32)

    # Deterministic param init (kaiming-uniform-ish bound, like Conv2d.reset_parameters).
    fan_in = Cin * K * K
    bound = 1.0 / jnp.sqrt(jnp.float32(fan_in))
    weight = jax.random.uniform(k_w, (Cout, Cin, K, K), dtype=jnp.float32,
                                minval=-bound, maxval=bound)
    gamma = jnp.ones((Cout,), jnp.float32)   # BatchNorm2d weight init
    beta = jnp.zeros((Cout,), jnp.float32)   # BatchNorm2d bias init

    out = generic_conv_forward(x, weight, gamma, beta, K, PAD)
    out = jax.block_until_ready(out)
    assert out.shape == (N, Cout, H, W)

    # Compare against a reference with bf16-quantized conv inputs (f32 accumulation); the
    # remaining drift comes from the bf16 output store — expected with the bf16 compute path.
    ref = reference_forward(x, weight, gamma, beta, PAD, conv_dtype=jnp.bfloat16)
    assert jnp.allclose(out, ref, atol=2e-2, rtol=2e-2), "mismatch vs JAX reference"

    print("KERNEL_OK")
</pallas_src>

<mosaic_0001>
module attributes {stable_mosaic.version = 11 : i64} {
  func.func @conv_stats_kernel(%arg0: i32, %arg1: i32, %arg2: memref<512x36xbf16, #tpu.memory_space<vmem>>, %arg3: memref<36x128xbf16, #tpu.memory_space<vmem>>, %arg4: memref<8x128xf32, #tpu.memory_space<vmem>>, %arg5: memref<8x128xf32, #tpu.memory_space<vmem>>) attributes {dimension_semantics = [#tpu.dimension_semantics<parallel>, #tpu.dimension_semantics<arbitrary>], iteration_bounds = array<i64: 1, 1>, scalar_prefetch = 0 : i64, scratch_operands = 0 : i64, tpu.core_type = #tpu.core_type<tc>, window_params = [{transform_indices = @transform_0, window_bounds = array<i64: 512, 36>}, {pipeline_mode = #tpu.pipeline_mode<synchronous>, transform_indices = @transform_1, window_bounds = array<i64: 36, 128>}, {transform_indices = @transform_2, window_bounds = array<i64: 8, 128>}, {transform_indices = @transform_3, window_bounds = array<i64: 8, 128>}]} {
    %c0 = arith.constant 0 : index
    %c0_0 = arith.constant 0 : index
    %0 = vector.load %arg2[%c0, %c0_0] : memref<512x36xbf16, #tpu.memory_space<vmem>>, vector<512x36xbf16>
    %c0_1 = arith.constant 0 : index
    %c0_2 = arith.constant 0 : index
    %1 = vector.load %arg3[%c0_1, %c0_2] : memref<36x128xbf16, #tpu.memory_space<vmem>>, vector<36x128xbf16>
    %cst = arith.constant dense<0.000000e+00> : vector<512x128xf32>
    %2 = tpu.matmul %0, %1, %cst {dimension_numbers = #tpu.dot_dimension_numbers<[1], [0], [0], [1], [0, 0, 1, 1], [], []>} : vector<512x36xbf16>, vector<36x128xbf16>, vector<512x128xf32> -> vector<512x128xf32>
    %c0_i32 = arith.constant 0 : i32
    %3 = arith.cmpi eq, %arg1, %c0_i32 : i32
    %4 = arith.extui %3 : i1 to i32
    %c0_i32_3 = arith.constant 0 : i32
    %5 = arith.cmpi ne, %4, %c0_i32_3 : i32
    scf.if %5 {
      %cst_14 = arith.constant 0.000000e+00 : f32
      %21 = vector.broadcast %cst_14 : f32 to vector<8x128xf32>
      %c0_15 = arith.constant 0 : index
      %c0_16 = arith.constant 0 : index
      %22 = vector.load %arg4[%c0_15, %c0_16] : memref<8x128xf32, #tpu.memory_space<vmem>>, vector<8x128xf32>
      tpu.vector_store %arg4[%c0_15, %c0_16], %21 {strides = array<i32>} : memref<8x128xf32, #tpu.memory_space<vmem>>, vector<8x128xf32>,
      %cst_17 = arith.constant 0.000000e+00 : f32
      %23 = vector.broadcast %cst_17 : f32 to vector<8x128xf32>
      %c0_18 = arith.constant 0 : index
      %c0_19 = arith.constant 0 : index
      %24 = vector.load %arg5[%c0_18, %c0_19] : memref<8x128xf32, #tpu.memory_space<vmem>>, vector<8x128xf32>
      tpu.vector_store %arg5[%c0_18, %c0_19], %23 {strides = array<i32>} : memref<8x128xf32, #tpu.memory_space<vmem>>, vector<8x128xf32>,
    } else {
    }
    %cst_4 = arith.constant dense<0.000000e+00> : vector<128xf32>
    %6 = vector.multi_reduction <add>, %2, %cst_4 [0] : vector<512x128xf32> to vector<128xf32>
    %7 = vector.shape_cast %6 : vector<128xf32> to vector<1x128xf32>
    %8 = arith.mulf %2, %2 : vector<512x128xf32>
    %cst_5 = arith.constant dense<0.000000e+00> : vector<128xf32>
    %9 = vector.multi_reduction <add>, %8, %cst_5 [0] : vector<512x128xf32> to vector<128xf32>
    %10 = vector.shape_cast %9 : vector<128xf32> to vector<1x128xf32>
    %c0_6 = arith.constant 0 : index
    %c0_7 = arith.constant 0 : index
    %11 = vector.load %arg4[%c0_6, %c0_7] : memref<8x128xf32, #tpu.memory_space<vmem>>, vector<8x128xf32>
    %12 = vector.shape_cast %7 : vector<1x128xf32> to vector<1x128xf32>
    %13 = vector.broadcast %12 : vector<1x128xf32> to vector<8x128xf32>
    %14 = arith.addf %11, %13 : vector<8x128xf32>
    %c0_8 = arith.constant 0 : index
    %c0_9 = arith.constant 0 : index
    %15 = vector.load %arg4[%c0_8, %c0_9] : memref<8x128xf32, #tpu.memory_space<vmem>>, vector<8x128xf32>
    tpu.vector_store %arg4[%c0_8, %c0_9], %14 {strides = array<i32>} : memref<8x128xf32, #tpu.memory_space<vmem>>, vector<8x128xf32>,
    %c0_10 = arith.constant 0 : index
    %c0_11 = arith.constant 0 : index
    %16 = vector.load %arg5[%c0_10, %c0_11] : memref<8x128xf32, #tpu.memory_space<vmem>>, vector<8x128xf32>
    %17 = vector.shape_cast %10 : vector<1x128xf32> to vector<1x128xf32>
    %18 = vector.broadcast %17 : vector<1x128xf32> to vector<8x128xf32>
    %19 = arith.addf %16, %18 : vector<8x128xf32>
    %c0_12 = arith.constant 0 : index
    %c0_13 = arith.constant 0 : index
    %20 = vector.load %arg5[%c0_12, %c0_13] : memref<8x128xf32, #tpu.memory_space<vmem>>, vector<8x128xf32>
    tpu.vector_store %arg5[%c0_12, %c0_13], %19 {strides = array<i32>} : memref<8x128xf32, #tpu.memory_space<vmem>>, vector<8x128xf32>,
    return
  }
  func.func @transform_0(%arg0: i32, %arg1: i32) -> (i32, i32) {
    %c1_i32 = arith.constant 1 : i32
    %0 = arith.muli %arg0, %c1_i32 : i32
    %1 = arith.addi %0, %arg1 : i32
    %c0_i32 = arith.constant 0 : i32
    %c0_i32_0 = arith.constant 0 : i32
    return %1, %c0_i32 : i32, i32
  }
  func.func @transform_1(%arg0: i32, %arg1: i32) -> (i32, i32) {
    %c0_i32 = arith.constant 0 : i32
    %c0_i32_0 = arith.constant 0 : i32
    %c0_i32_1 = arith.constant 0 : i32
    return %c0_i32, %c0_i32_0 : i32, i32
  }
  func.func @transform_2(%arg0: i32, %arg1: i32) -> (i32, i32) {
    %c0_i32 = arith.constant 0 : i32
    %c0_i32_0 = arith.constant 0 : i32
    return %arg0, %c0_i32 : i32, i32
  }
  func.func @transform_3(%arg0: i32, %arg1: i32) -> (i32, i32) {
    %c0_i32 = arith.constant 0 : i32
    %c0_i32_0 = arith.constant 0 : i32
    return %arg0, %c0_i32 : i32, i32
  }
}

module attributes {stable_mosaic.version = 11 : i64} {
  func.func @conv_affine_relu_kernel(%arg0: i32, %arg1: memref<512x36xbf16, #tpu.memory_space<vmem>>, %arg2: memref<36x128xbf16, #tpu.memory_space<vmem>>, %arg3: memref<1x128xf32, #tpu.memory_space<vmem>>, %arg4: memref<1x128xf32, #tpu.memory_space<vmem>>, %arg5: memref<512x128xbf16, #tpu.memory_space<vmem>>) attributes {dimension_semantics = [#tpu.dimension_semantics<parallel>], iteration_bounds = array<i64: 1>, scalar_prefetch = 0 : i64, scratch_operands = 0 : i64, tpu.core_type = #tpu.core_type<tc>, window_params = [{transform_indices = @transform_0, window_bounds = array<i64: 512, 36>}, {pipeline_mode = #tpu.pipeline_mode<synchronous>, transform_indices = @transform_1, window_bounds = array<i64: 36, 128>}, {pipeline_mode = #tpu.pipeline_mode<synchronous>, transform_indices = @transform_2, window_bounds = array<i64: 1, 128>}, {pipeline_mode = #tpu.pipeline_mode<synchronous>, transform_indices = @transform_3, window_bounds = array<i64: 1, 128>}, {transform_indices = @transform_4, window_bounds = array<i64: 512, 128>}]} {
    %c0 = arith.constant 0 : index
    %c0_0 = arith.constant 0 : index
    %0 = vector.load %arg1[%c0, %c0_0] : memref<512x36xbf16, #tpu.memory_space<vmem>>, vector<512x36xbf16>
    %c0_1 = arith.constant 0 : index
    %c0_2 = arith.constant 0 : index
    %1 = vector.load %arg2[%c0_1, %c0_2] : memref<36x128xbf16, #tpu.memory_space<vmem>>, vector<36x128xbf16>
    %cst = arith.constant dense<0.000000e+00> : vector<512x128xf32>
    %2 = tpu.matmul %0, %1, %cst {dimension_numbers = #tpu.dot_dimension_numbers<[1], [0], [0], [1], [0, 0, 1, 1], [], []>} : vector<512x36xbf16>, vector<36x128xbf16>, vector<512x128xf32> -> vector<512x128xf32>
    %c0_3 = arith.constant 0 : index
    %c0_4 = arith.constant 0 : index
    %3 = vector.load %arg3[%c0_3, %c0_4] : memref<1x128xf32, #tpu.memory_space<vmem>>, vector<1x128xf32>
    %4 = vector.broadcast %3 : vector<1x128xf32> to vector<512x128xf32>
    %5 = arith.mulf %2, %4 : vector<512x128xf32>
    %c0_5 = arith.constant 0 : index
    %c0_6 = arith.constant 0 : index
    %6 = vector.load %arg4[%c0_5, %c0_6] : memref<1x128xf32, #tpu.memory_space<vmem>>, vector<1x128xf32>
    %7 = vector.broadcast %6 : vector<1x128xf32> to vector<512x128xf32>
    %8 = arith.addf %5, %7 : vector<512x128xf32>
    %cst_7 = arith.constant 0.000000e+00 : f32
    %9 = vector.broadcast %cst_7 : f32 to vector<512x128xf32>
    %10 = arith.maximumf %8, %9 : vector<512x128xf32>
    %11 = arith.truncf %10 : vector<512x128xf32> to vector<512x128xbf16>
    %c0_8 = arith.constant 0 : index
    %c0_9 = arith.constant 0 : index
    %12 = vector.load %arg5[%c0_8, %c0_9] : memref<512x128xbf16, #tpu.memory_space<vmem>>, vector<512x128xbf16>
    tpu.vector_store %arg5[%c0_8, %c0_9], %11 {strides = array<i32>} : memref<512x128xbf16, #tpu.memory_space<vmem>>, vector<512x128xbf16>,
    return
  }
  func.func @transform_0(%arg0: i32) -> (i32, i32) {
    %c0_i32 = arith.constant 0 : i32
    %c0_i32_0 = arith.constant 0 : i32
    return %arg0, %c0_i32 : i32, i32
  }
  func.func @transform_1(%arg0: i32) -> (i32, i32) {
    %c0_i32 = arith.constant 0 : i32
    %c0_i32_0 = arith.constant 0 : i32
    %c0_i32_1 = arith.constant 0 : i32
    return %c0_i32, %c0_i32_0 : i32, i32
  }
  func.func @transform_2(%arg0: i32) -> (i32, i32) {
    %c0_i32 = arith.constant 0 : i32
    %c0_i32_0 = arith.constant 0 : i32
    %c0_i32_1 = arith.constant 0 : i32
    return %c0_i32, %c0_i32_0 : i32, i32
  }
  func.func @transform_3(%arg0: i32) -> (i32, i32) {
    %c0_i32 = arith.constant 0 : i32
    %c0_i32_0 = arith.constant 0 : i32
    %c0_i32_1 = arith.constant 0 : i32
    return %c0_i32, %c0_i32_0 : i32, i32
  }
  func.func @transform_4(%arg0: i32) -> (i32, i32) {
    %c0_i32 = arith.constant 0 : i32
    %c0_i32_0 = arith.constant 0 : i32
    return %arg0, %c0_i32 : i32, i32
  }
}

</mosaic_0001>

<bundles_post_ra>
// kernel: generic_conv_forward.2
= control target key start
LH: loop header
LB: loop body
LE: loop exit
PB: predicated region body
PF: predicated region fallthrough
CT: control target
= control target key end

     0   :  { %vm280_vm0 = vcmask 293888   ;;  %vm377_vm1 = vcmask 1041408   ;;  %s1437_s1 = inlined_call_operand.vmem [shape: bf16[36,128], index: 1, kind: input, shape index: {}]   ;;  %s1438_s0 = inlined_call_operand.vmem [shape: bf16[512,36], index: 0, kind: input, shape index: {}]   ;;  %s1439_s2 = inlined_call_operand.vmem [shape: f32[8,128], index: 2, kind: output, shape index: {0}]   ;;  %s1440_s3 = inlined_call_operand.vmem [shape: f32[8,128], index: 3, kind: output, shape index: {1}]  }
   0x1   :  { %v1079_v0 = vld [vmem:[%s1437_s1] sm:$0xff]   ;;  %v1080_v1 = vld [vmem:[%s1437_s1 + $0x8] sm:$0xff]   ;;  %v1081_v2 = vld [vmem:[%s1437_s1 + $0x10] ss:$0 sps:$4 sm:$0x33]  }
   0x2   :  { %1000 = vmatprep.subr.bf16.mxu0 %v1079_v0  ;;  %v1082_v3 = vld [vmem:[%s1438_s0] sm:$0xff]   ;;  %1070 = vmatprep.subr.bf16.mxu1 %v1079_v0  ;;  %v379_v4 = vsel %vm377_vm1, %v1081_v2, 0  ;;  %v1083_v5 = vld [vmem:[%s1438_s0 + $0x8] sm:$0xff]   ;;  %v1084_v6 = vld [vmem:[%s1438_s0 + $0x10] sm:$0xff]  }
   0x3   :  { %1001 = vmatpush3.bf16.msra.mxu0 %v1079_v0  ;;  %1073 = vmatpush3.bf16.msra.mxu1 %v1079_v0  ;;  %v1085_v7 = vld [vmem:[%s1438_s0 + $0x18] sm:$0xff]   ;;  %v1086_v8 = vld [vmem:[%s1438_s0 + $0x20] sm:$0xff]   ;;  %v1099_v10 = vld [vmem:[%s1438_s0 + $0x88] sm:$0xff]  }
   0x4   :  { %1002 = vmatprep.subr.bf16.mxu0 %v1080_v1  ;;  %1006 = vmatprep.mubr.msk.bf16.mxu0 %vm280_vm0, %v1082_v3  ;;  %v1098_v9 = vld [vmem:[%s1438_s0 + $0x80] sm:$0xff]   ;;  %v1100_v11 = vld [vmem:[%s1438_s0 + $0x90] sm:$0xff]   ;;  %v1087_v12 = vld [vmem:[%s1438_s0 + $0x28] sm:$0xff]  }
   0x5   :  { %1071 = vmatprep.subr.bf16.mxu1 %v1080_v1  ;;  %1038 = vmatprep.mubr.msk.bf16.mxu1 %vm280_vm0, %v1098_v9  ;;  %v1088_v13 = vld [vmem:[%s1438_s0 + $0x30] sm:$0xff]   ;;  %v1101_v14 = vld [vmem:[%s1438_s0 + $0x98] sm:$0xff]   ;;  %v1102_v15 = vld [vmem:[%s1438_s0 + $0xa0] sm:$0xff]  }
   0x6   :  { %v1089_v16 = vld [vmem:[%s1438_s0 + $0x38] sm:$0xff]   ;;  %v1103_v17 = vld [vmem:[%s1438_s0 + $0xa8] sm:$0xff]   ;;  %v1090_v18 = vld [vmem:[%s1438_s0 + $0x40] sm:$0xff]  }
   0x7   :  { %1003 = vmatpush3.bf16.msra.mxu0 %v1080_v1  ;;  %1074 = vmatpush3.bf16.msra.mxu1 %v1080_v1  ;;  %v1104_v19 = vld [vmem:[%s1438_s0 + $0xb0] sm:$0xff]   ;;  %v1091_v20 = vld [vmem:[%s1438_s0 + $0x48] sm:$0xff]   ;;  %v1105_v21 = vld [vmem:[%s1438_s0 + $0xb8] sm:$0xff]  }
   0x8   :  { %1076 = vmatprep.subr.msk.bf16.mxu0 %vm377_vm1, %v1081_v2  ;;  %1077 = vmatprep.subr.msk.bf16.mxu1 %vm377_vm1, %v1081_v2  ;;  %v1092_v22 = vld [vmem:[%s1438_s0 + $0x50] sm:$0xff]   ;;  %v1106_v23 = vld [vmem:[%s1438_s0 + $0xc0] sm:$0xff]   ;;  %v1093_v24 = vld [vmem:[%s1438_s0 + $0x58] sm:$0xff]  }
   0x9   :  { %v1107_v25 = vld [vmem:[%s1438_s0 + $0xc8] sm:$0xff]   ;;  %v1094_v26 = vld [vmem:[%s1438_s0 + $0x60] sm:$0xff]   ;;  %v1108_v27 = vld [vmem:[%s1438_s0 + $0xd0] sm:$0xff]  }
   0xa   :  { %v1095_v28 = vld [vmem:[%s1438_s0 + $0x68] sm:$0xff]   ;;  %v1109_v29 = vld [vmem:[%s1438_s0 + $0xd8] sm:$0xff]   ;;  %v1096_v30 = vld [vmem:[%s1438_s0 + $0x70] sm:$0xff]  }
   0xb   :  { %1005 = vmatpush3.bf16.msra.mxu0 %v379_v4  ;;  %1075 = vmatpush3.bf16.msra.mxu1 %v379_v4  ;;  %v1110_v31 = vld [vmem:[%s1438_s0 + $0xe0] sm:$0xff]   ;;  %v1097_v32 = vld [vmem:[%s1438_s0 + $0x78] sm:$0xff]   ;;  %v1111_v33 = vld [vmem:[%s1438_s0 + $0xe8] sm:$0xff]  }
   0xc   :  { %v1112_v34 = vld [vmem:[%s1438_s0 + $0xf0] sm:$0xff]   ;;  %v1113_v35 = vld [vmem:[%s1438_s0 + $0xf8] sm:$0xff]  }
   0xe   :  { %1007 = vmatmul.mubr.msk.bf16.vlgmr.msra.gmra.mrb[0].mxu0 %vm280_vm0, %v1083_v5  ;;  %1039 = vmatmul.mubr.msk.bf16.vlgmr.msra.gmra.mrb[0].mxu1 %vm280_vm0, %v1099_v10 }
   0xf   :  { %1010 = vmatprep.mubr.msk.bf16.mxu0 %vm280_vm0, %v1084_v6  ;;  %1042 = vmatprep.mubr.msk.bf16.mxu1 %vm280_vm0, %v1100_v11 }
  0x16   :  { %1011 = vmatmul.mubr.msk.bf16.gmra.mrb[4].mxu0 %vm280_vm0, %v1085_v7  ;;  %1043 = vmatmul.mubr.msk.bf16.gmra.mrb[4].mxu1 %vm280_vm0, %v1101_v14 }
  0x17   :  { %1014 = vmatprep.mubr.msk.bf16.mxu0 %vm280_vm0, %v1086_v8  ;;  %1046 = vmatprep.mubr.msk.bf16.mxu1 %vm280_vm0, %v1102_v15 }
  0x1e   :  { %1015 = vmatmul.mubr.msk.bf16.gmra.mrb[8].mxu0 %vm280_vm0, %v1087_v12  ;;  %1047 = vmatmul.mubr.msk.bf16.gmra.mrb[8].mxu1 %vm280_vm0, %v1103_v17 }
  0x1f   :  { %1018 = vmatprep.mubr.msk.bf16.mxu0 %vm280_vm0, %v1088_v13  ;;  %1050 = vmatprep.mubr.msk.bf16.mxu1 %vm280_vm0, %v1104_v19 }
  0x26   :  { %1019 = vmatmul.mubr.msk.bf16.gmra.mrb[12].mxu0 %vm280_vm0, %v1089_v16  ;;  %1051 = vmatmul.mubr.msk.bf16.gmra.mrb[12].mxu1 %vm280_vm0, %v1105_v21 }
  0x27   :  { %1022 = vmatprep.mubr.msk.bf16.mxu0 %vm280_vm0, %v1090_v18  ;;  %1054 = vmatprep.mubr.msk.bf16.mxu1 %vm280_vm0, %v1106_v23 }
  0x2e   :  { %1023 = vmatmul.mubr.msk.bf16.gmra.mrb[16].mxu0 %vm280_vm0, %v1091_v20  ;;  %1055 = vmatmul.mubr.msk.bf16.gmra.mrb[16].mxu1 %vm280_vm0, %v1107_v25 }
  0x2f   :  { %1026 = vmatprep.mubr.msk.bf16.mxu0 %vm280_vm0, %v1092_v22  ;;  %1058 = vmatprep.mubr.msk.bf16.mxu1 %vm280_vm0, %v1108_v27 }
  0x36   :  { %1027 = vmatmul.mubr.msk.bf16.gmra.mrb[20].mxu0 %vm280_vm0, %v1093_v24  ;;  %1059 = vmatmul.mubr.msk.bf16.gmra.mrb[20].mxu1 %vm280_vm0, %v1109_v29 }
  0x37   :  { %1030 = vmatprep.mubr.msk.bf16.mxu0 %vm280_vm0, %v1094_v26  ;;  %1062 = vmatprep.mubr.msk.bf16.mxu1 %vm280_vm0, %v1110_v31 }
  0x3e   :  { %1031 = vmatmul.mubr.msk.bf16.gmra.mrb[24].mxu0 %vm280_vm0, %v1095_v28  ;;  %1063 = vmatmul.mubr.msk.bf16.gmra.mrb[24].mxu1 %vm280_vm0, %v1111_v33 }
  0x3f   :  { %1034 = vmatprep.mubr.msk.bf16.mxu0 %vm280_vm0, %v1096_v30  ;;  %1066 = vmatprep.mubr.msk.bf16.mxu1 %vm280_vm0, %v1112_v34 }
  0x46   :  { %1035 = vmatmul.mubr.msk.bf16.gmra.mrb[28].mxu0 %vm280_vm0, %v1097_v32  ;;  %1067 = vmatmul.mubr.msk.bf16.gmra.mrb[28].mxu1 %vm280_vm0, %v1113_v35 }
  0xe1   :  { %v1008_v36 = vpop.f32.mrb[0].mxu0  ;;  %v1271_v50 = vpop.f32.mrb[0].mxu1 }
  0xe2   :  { %v415_v37 = vpop.f32.mrb[1].mxu0  ;;  %v747_v43 = vmul.f32 %v1008_v36, %v1008_v36  ;;  %v1273_v52 = vpop.f32.mrb[1].mxu1 }
  0xe3   :  { %v1009_v38 = vpop.f32.mrb[2].mxu0  ;;  %v745_v40 = vmul.f32 %v415_v37, %v415_v37  ;;  %v1275_v57 = vpop.f32.mrb[2].mxu1 }
  0xe4   :  { %v418_v39 = vpop.f32.mrb[3].mxu0  ;;  %v748_v46 = vmul.f32 %v1009_v38, %v1009_v38  ;;  %v1277_v59 = vpop.f32.mrb[3].mxu1 }
  0xe5   :  { %v676_v41 = vadd.f32 %v418_v39, %v415_v37  ;;  %v746_v42 = vmul.f32 %v418_v39, %v418_v39 }
  0xe7   :  { %v677_v44 = vadd.f32 %v1008_v36, %v676_v41  ;;  %v809_v45 = vadd.f32 %v746_v42, %v745_v40 }
  0xe9   :  { %v810_v47 = vadd.f32 %v809_v45, %v747_v43  ;;  %v1012_v48 = vpop.f32.mrb[4].mxu0  ;;  %v678_v49 = vadd.f32 %v1009_v38, %v677_v44  ;;  %v1279_v6 = vpop.f32.mrb[4].mxu1 }
  0xea   :  { %v431_v51 = vpop.f32.mrb[5].mxu0  ;;  %v751_v63 = vmul.f32 %v1012_v48, %v1012_v48  ;;  %v1281_v8 = vpop.f32.mrb[5].mxu1 }
  0xeb   :  { %v679_v53 = vadd.f32 %v678_v49, %v431_v51  ;;  %v749_v54 = vmul.f32 %v431_v51, %v431_v51  ;;  %v811_v55 = vadd.f32 %v810_v47, %v748_v46  ;;  %v1013_v56 = vpop.f32.mrb[6].mxu0  ;;  %v1283_v13 = vpop.f32.mrb[6].mxu1 }
  0xec   :  { %v434_v58 = vpop.f32.mrb[7].mxu0  ;;  %v752_v2 = vmul.f32 %v1013_v56, %v1013_v56  ;;  %v1285_v15 = vpop.f32.mrb[7].mxu1 }
  0xed   :  { %v812_v60 = vadd.f32 %v811_v55, %v749_v54  ;;  %v680_v61 = vadd.f32 %v679_v53, %v434_v58  ;;  %v750_v62 = vmul.f32 %v434_v58, %v434_v58 }
  0xef   :  { %v681_v0 = vadd.f32 %v1012_v48, %v680_v61  ;;  %v813_v1 = vadd.f32 %v812_v60, %v750_v62 }
  0xf1   :  { %v814_v3 = vadd.f32 %v813_v1, %v751_v63  ;;  %v1016_v4 = vpop.f32.mrb[8].mxu0  ;;  %v682_v5 = vadd.f32 %v1013_v56, %v681_v0  ;;  %v1287_v26 = vpop.f32.mrb[8].mxu1 }
  0xf2   :  { %v447_v7 = vpop.f32.mrb[9].mxu0  ;;  %v755_v19 = vmul.f32 %v1016_v4, %v1016_v4  ;;  %v1289_v28 = vpop.f32.mrb[9].mxu1 }
  0xf3   :  { %v683_v9 = vadd.f32 %v682_v5, %v447_v7  ;;  %v753_v10 = vmul.f32 %v447_v7, %v447_v7  ;;  %v815_v11 = vadd.f32 %v814_v3, %v752_v2  ;;  %v1017_v12 = vpop.f32.mrb[10].mxu0  ;;  %v1291_v33 = vpop.f32.mrb[10].mxu1 }
  0xf4   :  { %v450_v14 = vpop.f32.mrb[11].mxu0  ;;  %v756_v22 = vmul.f32 %v1017_v12, %v1017_v12  ;;  %v1293_v35 = vpop.f32.mrb[11].mxu1 }
  0xf5   :  { %v816_v16 = vadd.f32 %v815_v11, %v753_v10  ;;  %v684_v17 = vadd.f32 %v683_v9, %v450_v14  ;;  %v754_v18 = vmul.f32 %v450_v14, %v450_v14 }
  0xf7   :  { %v685_v20 = vadd.f32 %v1016_v4, %v684_v17  ;;  %v817_v21 = vadd.f32 %v816_v16, %v754_v18 }
  0xf9   :  { %v818_v23 = vadd.f32 %v817_v21, %v755_v19  ;;  %v1020_v24 = vpop.f32.mrb[12].mxu0  ;;  %v686_v25 = vadd.f32 %v1017_v12, %v685_v20  ;;  %v1295_v46 = vpop.f32.mrb[12].mxu1 }
  0xfa   :  { %v463_v27 = vpop.f32.mrb[13].mxu0  ;;  %v759_v39 = vmul.f32 %v1020_v24, %v1020_v24  ;;  %v1297_v48 = vpop.f32.mrb[13].mxu1 }
  0xfb   :  { %v687_v29 = vadd.f32 %v686_v25, %v463_v27  ;;  %v757_v30 = vmul.f32 %v463_v27, %v463_v27  ;;  %v819_v31 = vadd.f32 %v818_v23, %v756_v22  ;;  %v1021_v32 = vpop.f32.mrb[14].mxu0  ;;  %v1299_v55 = vpop.f32.mrb[14].mxu1 }
  0xfc   :  { %v466_v34 = vpop.f32.mrb[15].mxu0  ;;  %v760_v42 = vmul.f32 %v1021_v32, %v1021_v32  ;;  %v1301_v58 = vpop.f32.mrb[15].mxu1 }
  0xfd   :  { %v820_v36 = vadd.f32 %v819_v31, %v757_v30  ;;  %v688_v37 = vadd.f32 %v687_v29, %v466_v34  ;;  %v758_v38 = vmul.f32 %v466_v34, %v466_v34 }
  0xff   :  { %v689_v40 = vadd.f32 %v1020_v24, %v688_v37  ;;  %v821_v41 = vadd.f32 %v820_v36, %v758_v38 }
 0x101   :  { %v822_v43 = vadd.f32 %v821_v41, %v759_v39  ;;  %v1024_v44 = vpop.f32.mrb[16].mxu0  ;;  %v690_v45 = vadd.f32 %v1021_v32, %v689_v40  ;;  %v1303_v7 = vpop.f32.mrb[16].mxu1 }
 0x102   :  { %v479_v47 = vpop.f32.mrb[17].mxu0  ;;  %v763_v63 = vmul.f32 %v1024_v44, %v1024_v44  ;;  %v1305_v10 = vpop.f32.mrb[17].mxu1 }
 0x103   :  { %v691_v49 = vadd.f32 %v690_v45, %v479_v47  ;;  %v761_v51 = vmul.f32 %v479_v47, %v479_v47  ;;  %v823_v53 = vadd.f32 %v822_v43, %v760_v42  ;;  %v1025_v54 = vpop.f32.mrb[18].mxu0  ;;  %v1307_v17 = vpop.f32.mrb[18].mxu1 }
 0x104   :  { %v482_v56 = vpop.f32.mrb[19].mxu0  ;;  %v764_v2 = vmul.f32 %v1025_v54, %v1025_v54  ;;  %v1309_v19 = vpop.f32.mrb[19].mxu1 }
 0x105   :  { %v824_v60 = vadd.f32 %v823_v53, %v761_v51  ;;  %v692_v61 = vadd.f32 %v691_v49, %v482_v56  ;;  %v762_v62 = vmul.f32 %v482_v56, %v482_v56 }
 0x107   :  { %v693_v0 = vadd.f32 %v1024_v44, %v692_v61  ;;  %v825_v1 = vadd.f32 %v824_v60, %v762_v62 }
 0x109   :  { %v826_v3 = vadd.f32 %v825_v1, %v763_v63  ;;  %v1028_v4 = vpop.f32.mrb[20].mxu0  ;;  %v694_v5 = vadd.f32 %v1025_v54, %v693_v0  ;;  %v1311_v32 = vpop.f32.mrb[20].mxu1 }
 0x10a   :  { %v495_v9 = vpop.f32.mrb[21].mxu0  ;;  %v767_v23 = vmul.f32 %v1028_v4, %v1028_v4  ;;  %v1313_v36 = vpop.f32.mrb[21].mxu1 }
 0x10b   :  { %v695_v11 = vadd.f32 %v694_v5, %v495_v9  ;;  %v765_v12 = vmul.f32 %v495_v9, %v495_v9  ;;  %v827_v14 = vadd.f32 %v826_v3, %v764_v2  ;;  %v1029_v16 = vpop.f32.mrb[22].mxu0  ;;  %v1315_v41 = vpop.f32.mrb[22].mxu1 }
 0x10c   :  { %v498_v18 = vpop.f32.mrb[23].mxu0  ;;  %v768_v27 = vmul.f32 %v1029_v16, %v1029_v16  ;;  %v1317_v43 = vpop.f32.mrb[23].mxu1 }
 0x10d   :  { %v828_v20 = vadd.f32 %v827_v14, %v765_v12  ;;  %v696_v21 = vadd.f32 %v695_v11, %v498_v18  ;;  %v766_v22 = vmul.f32 %v498_v18, %v498_v18 }
 0x10f   :  { %v697_v24 = vadd.f32 %v1028_v4, %v696_v21  ;;  %v829_v25 = vadd.f32 %v828_v20, %v766_v22 }
 0x111   :  { %v830_v29 = vadd.f32 %v829_v25, %v767_v23  ;;  %v1032_v30 = vpop.f32.mrb[24].mxu0  ;;  %v698_v31 = vadd.f32 %v1029_v16, %v697_v24  ;;  %v1319_v62 = vpop.f32.mrb[24].mxu1  ;;  %v777_v25 = vmul.f32 %v1273_v52, %v1273_v52 }
 0x112   :  { %v511_v34 = vpop.f32.mrb[25].mxu0  ;;  %v771_v49 = vmul.f32 %v1032_v30, %v1032_v30  ;;  %v1321_v0 = vpop.f32.mrb[25].mxu1 }
 0x113   :  { %v699_v37 = vadd.f32 %v698_v31, %v511_v34  ;;  %v769_v38 = vmul.f32 %v511_v34, %v511_v34  ;;  %v831_v39 = vadd.f32 %v830_v29, %v768_v27  ;;  %v1033_v40 = vpop.f32.mrb[26].mxu0  ;;  %v1323_v5 = vpop.f32.mrb[26].mxu1 }
 0x114   :  { %v514_v42 = vpop.f32.mrb[27].mxu0  ;;  %v772_v54 = vmul.f32 %v1033_v40, %v1033_v40  ;;  %v1325_v11 = vpop.f32.mrb[27].mxu1 }
 0x115   :  { %v832_v44 = vadd.f32 %v831_v39, %v769_v38  ;;  %v700_v45 = vadd.f32 %v699_v37, %v514_v42  ;;  %v770_v47 = vmul.f32 %v514_v42, %v514_v42  ;;  %v779_v42 = vmul.f32 %v1271_v50, %v1271_v50 }
 0x117   :  { %v701_v51 = vadd.f32 %v1032_v30, %v700_v45  ;;  %v833_v53 = vadd.f32 %v832_v44, %v770_v47 }
 0x119   :  { %v834_v56 = vadd.f32 %v833_v53, %v771_v49  ;;  %v1036_v60 = vpop.f32.mrb[28].mxu0  ;;  %v702_v61 = vadd.f32 %v1033_v40, %v701_v51  ;;  %v1329_v27 = vpop.f32.mrb[28].mxu1  ;;  %v778_v40 = vmul.f32 %v1277_v59, %v1277_v59  ;;  %v781_v51 = vmul.f32 %v1281_v8, %v1281_v8 }
 0x11a   :  { %v527_v63 = vpop.f32.mrb[29].mxu0  ;;  %v775_v18 = vmul.f32 %v1036_v60, %v1036_v60  ;;  %v1331_v29 = vpop.f32.mrb[29].mxu1 }
 0x11b   :  { %v703_v1 = vadd.f32 %v702_v61, %v527_v63  ;;  %v773_v2 = vmul.f32 %v527_v63, %v527_v63  ;;  %v835_v3 = vadd.f32 %v834_v56, %v772_v54  ;;  %v1037_v4 = vpop.f32.mrb[30].mxu0  ;;  %v1334_v34 = vpop.f32.mrb[30].mxu1 }
 0x11c   :  { %v530_v9 = vpop.f32.mrb[31].mxu0  ;;  %v776_v22 = vmul.f32 %v1037_v4, %v1037_v4  ;;  %v1336_v37 = vpop.f32.mrb[31].mxu1 }
 0x11d   :  { %v836_v12 = vadd.f32 %v835_v3, %v773_v2  ;;  %v704_v14 = vadd.f32 %v703_v1, %v530_v9  ;;  %v774_v16 = vmul.f32 %v530_v9, %v530_v9 }
 0x11f   :  { %v705_v20 = vadd.f32 %v1036_v60, %v704_v14  ;;  %v837_v21 = vadd.f32 %v836_v12, %v774_v16  ;;  %v782_v60 = vmul.f32 %v1285_v15, %v1285_v15  ;;  %v786_v12 = vmul.f32 %v1293_v35, %v1293_v35 }
 0x121   :  { %v838_v23 = vadd.f32 %v837_v21, %v775_v18  ;;  %v706_v24 = vadd.f32 %v1037_v4, %v705_v20 }
 0x123   :  { %v707_v30 = vadd.f32 %v706_v24, %v1273_v52  ;;  %v839_v31 = vadd.f32 %v838_v23, %v776_v22  ;;  %v780_v52 = vmul.f32 %v1275_v57, %v1275_v57  ;;  %v790_v24 = vmul.f32 %v1301_v58, %v1301_v58 }
 0x125   :  { %v840_v38 = vadd.f32 %v839_v31, %v777_v25  ;;  %v708_v39 = vadd.f32 %v707_v30, %v1277_v59 }
 0x127   :  { %v709_v44 = vadd.f32 %v1271_v50, %v708_v39  ;;  %v841_v45 = vadd.f32 %v840_v38, %v778_v40  ;;  %v783_v50 = vmul.f32 %v1279_v6, %v1279_v6 }
 0x129   :  { %v842_v47 = vadd.f32 %v841_v45, %v779_v42  ;;  %v710_v49 = vadd.f32 %v1275_v57, %v709_v44  ;;  %v784_v57 = vmul.f32 %v1283_v13, %v1283_v13  ;;  %v794_v44 = vmul.f32 %v1309_v19, %v1309_v19 }
 0x12b   :  { %v711_v53 = vadd.f32 %v710_v49, %v1281_v8  ;;  %v843_v54 = vadd.f32 %v842_v47, %v780_v52  ;;  %v785_v8 = vmul.f32 %v1289_v28, %v1289_v28 }
 0x12d   :  { %v844_v56 = vadd.f32 %v843_v54, %v781_v51  ;;  %v712_v59 = vadd.f32 %v711_v53, %v1285_v15 }
 0x12f   :  { %v713_v61 = vadd.f32 %v1279_v6, %v712_v59  ;;  %v845_v63 = vadd.f32 %v844_v56, %v782_v60  ;;  %v787_v6 = vmul.f32 %v1287_v26, %v1287_v26  ;;  %v798_v56 = vmul.f32 %v1317_v43, %v1317_v43 }
 0x131   :  { %v846_v1 = vadd.f32 %v845_v63, %v783_v50  ;;  %v714_v2 = vadd.f32 %v1283_v13, %v713_v61  ;;  %v788_v13 = vmul.f32 %v1291_v33, %v1291_v33 }
 0x133   :  { %v715_v3 = vadd.f32 %v714_v2, %v1289_v28  ;;  %v847_v4 = vadd.f32 %v846_v1, %v784_v57  ;;  %v789_v28 = vmul.f32 %v1297_v48, %v1297_v48  ;;  %v802_v2 = vmul.f32 %v1325_v11, %v1325_v11 }
 0x135   :  { %v848_v9 = vadd.f32 %v847_v4, %v785_v8  ;;  %v716_v15 = vadd.f32 %v715_v3, %v1293_v35 }
 0x137   :  { %v717_v14 = vadd.f32 %v1287_v26, %v716_v15  ;;  %v849_v16 = vadd.f32 %v848_v9, %v786_v12  ;;  %v791_v26 = vmul.f32 %v1295_v46, %v1295_v46 }
 0x139   :  { %v850_v18 = vadd.f32 %v849_v16, %v787_v6  ;;  %v718_v20 = vadd.f32 %v1291_v33, %v717_v14  ;;  %v792_v33 = vmul.f32 %v1299_v55, %v1299_v55  ;;  %v806_v14 = vmul.f32 %v1336_v37, %v1336_v37 }
 0x13b   :  { %v719_v21 = vadd.f32 %v718_v20, %v1297_v48  ;;  %v851_v22 = vadd.f32 %v850_v18, %v788_v13  ;;  %v793_v48 = vmul.f32 %v1305_v10, %v1305_v10 }
 0x13d   :  { %v852_v23 = vadd.f32 %v851_v22, %v789_v28  ;;  %v720_v35 = vadd.f32 %v719_v21, %v1301_v58 }
 0x13f   :  { %v721_v25 = vadd.f32 %v1295_v46, %v720_v35  ;;  %v853_v30 = vadd.f32 %v852_v23, %v790_v24  ;;  %v795_v46 = vmul.f32 %v1303_v7, %v1303_v7 }
 0x141   :  { %v854_v31 = vadd.f32 %v853_v30, %v791_v26  ;;  %v722_v38 = vadd.f32 %v1299_v55, %v721_v25  ;;  %v796_v55 = vmul.f32 %v1307_v17, %v1307_v17 }
 0x143   :  { %v723_v39 = vadd.f32 %v722_v38, %v1305_v10  ;;  %v855_v40 = vadd.f32 %v854_v31, %v792_v33  ;;  %v797_v10 = vmul.f32 %v1313_v36, %v1313_v36 }
 0x145   :  { %v856_v42 = vadd.f32 %v855_v40, %v793_v48  ;;  %v724_v58 = vadd.f32 %v723_v39, %v1309_v19 }
 0x147   :  { %v725_v45 = vadd.f32 %v1303_v7, %v724_v58  ;;  %v857_v52 = vadd.f32 %v856_v42, %v794_v44  ;;  %v799_v7 = vmul.f32 %v1311_v32, %v1311_v32 }
 0x149   :  { %v858_v47 = vadd.f32 %v857_v52, %v795_v46  ;;  %v726_v49 = vadd.f32 %v1307_v17, %v725_v45  ;;  %v800_v17 = vmul.f32 %v1315_v41, %v1315_v41 }
 0x14b   :  { %v727_v51 = vadd.f32 %v726_v49, %v1313_v36  ;;  %v859_v53 = vadd.f32 %v858_v47, %v796_v55  ;;  %v801_v36 = vmul.f32 %v1321_v0, %v1321_v0 }
 0x14d   :  { %v860_v54 = vadd.f32 %v859_v53, %v797_v10  ;;  %v728_v19 = vadd.f32 %v727_v51, %v1317_v43 }
 0x14f   :  { %v729_v59 = vadd.f32 %v1311_v32, %v728_v19  ;;  %v861_v60 = vadd.f32 %v860_v54, %v798_v56  ;;  %v803_v32 = vmul.f32 %v1319_v62, %v1319_v62 }
 0x151   :  { %v862_v50 = vadd.f32 %v861_v60, %v799_v7  ;;  %v730_v61 = vadd.f32 %v1315_v41, %v729_v59  ;;  %v804_v41 = vmul.f32 %v1323_v5, %v1323_v5 }
 0x153   :  { %v731_v63 = vadd.f32 %v730_v61, %v1321_v0  ;;  %v863_v57 = vadd.f32 %v862_v50, %v800_v17  ;;  %v805_v0 = vmul.f32 %v1331_v29, %v1331_v29 }
 0x155   :  { %v864_v1 = vadd.f32 %v863_v57, %v801_v36  ;;  %v732_v43 = vadd.f32 %v731_v63, %v1325_v11 }
 0x157   :  { %v733_v8 = vadd.f32 %v1319_v62, %v732_v43  ;;  %v865_v3 = vadd.f32 %v864_v1, %v802_v2  ;;  %v807_v62 = vmul.f32 %v1329_v27, %v1329_v27 }
 0x159   :  { %v866_v4 = vadd.f32 %v865_v3, %v803_v32  ;;  %v734_v9 = vadd.f32 %v1323_v5, %v733_v8  ;;  %v808_v5 = vmul.f32 %v1334_v34, %v1334_v34 }
 0x15b   :  { %v735_v15 = vadd.f32 %v734_v9, %v1331_v29  ;;  %v867_v12 = vadd.f32 %v866_v4, %v804_v41 }
 0x15d   :  { %v868_v6 = vadd.f32 %v867_v12, %v805_v0  ;;  %v736_v11 = vadd.f32 %v735_v15, %v1336_v37 }
 0x15f   :  { %v737_v16 = vadd.f32 %v1329_v27, %v736_v11  ;;  %v869_v13 = vadd.f32 %v868_v6, %v806_v14 }
 0x161   :  { %v738_v18 = vadd.f32 %v1334_v34, %v737_v16  ;;  %v870_v20 = vadd.f32 %v869_v13, %v807_v62 }
 0x163   :  { %v739_v29 = vrot.slane %v738_v18, 4  ;;  %v871_v28 = vadd.f32 %v870_v20, %v808_v5 }
 0x165   :  { %v740_v21 = vadd.f32 %v739_v29, %v738_v18  ;;  %v872_v22 = vrot.slane %v871_v28, 4 }
 0x167   :  { %v741_v23 = vrot.slane %v740_v21, 2  ;;  %v873_v35 = vadd.f32 %v872_v22, %v871_v28 }
 0x169   :  { %v742_v24 = vadd.f32 %v741_v23, %v740_v21  ;;  %v874_v37 = vrot.slane %v873_v35, 2 }
 0x16b   :  { %v743_v26 = vrot.slane %v742_v24, 1  ;;  %v875_v25 = vadd.f32 %v874_v37, %v873_v35 }
 0x16d   :  { %v744_v30 = vadd.f32 %v743_v26, %v742_v24  ;;  %v876_v33 = vrot.slane %v875_v25, 1 }
 0x16f   :  { %v877_v27 = vadd.f32 %v876_v33, %v875_v25  ;;  %880 = vst [vmem:[%s1439_s2] sm:$0xff] %v744_v30 }
 0x171   :  { %883 = vst [vmem:[%s1440_s3] sm:$0xff] %v877_v27 }

// kernel: generic_conv_forward.3
= control target key start
LH: loop header
LB: loop body
LE: loop exit
PB: predicated region body
PF: predicated region fallthrough
CT: control target
= control target key end

     0   :  { %vm262_vm0 = vcmask 293888   ;;  %vm359_vm1 = vcmask 1041408   ;;  %s2114_s1 = inlined_call_operand.vmem [shape: bf16[36,128], index: 1, kind: input, shape index: {}]   ;;  %s2115_s0 = inlined_call_operand.vmem [shape: bf16[512,36], index: 0, kind: input, shape index: {}]   ;;  %s2116_s2 = inlined_call_operand.vmem [shape: f32[1,128], index: 2, kind: input, shape index: {}]   ;;  %s2117_s3 = inlined_call_operand.vmem [shape: f32[1,128], index: 3, kind: input, shape index: {}]   ;;  %s2118_s4 = inlined_call_operand.vmem [shape: bf16[512,128], index: 4, kind: output, shape index: {}]  }
   0x1   :  { %v1683_v0 = vld [vmem:[%s2114_s1] sm:$0xff]   ;;  %v1684_v1 = vld [vmem:[%s2114_s1 + $0x8] sm:$0xff]   ;;  %v1685_v2 = vld [vmem:[%s2114_s1 + $0x10] ss:$0 sps:$4 sm:$0x33]  }
   0x2   :  { %1605 = vmatprep.subr.bf16.mxu0 %v1683_v0  ;;  %1675 = vmatprep.subr.bf16.mxu1 %v1683_v0  ;;  %v1686_v3 = vld [vmem:[%s2115_s0] sm:$0xff]   ;;  %v361_v5 = vsel %vm359_vm1, %v1685_v2, 0  ;;  %v1688_v6 = vld [vmem:[%s2115_s0 + $0x8] sm:$0xff]   ;;  %v1690_v8 = vld [vmem:[%s2115_s0 + $0x10] sm:$0xff]  }
   0x3   :  { %1606 = vmatpush3.bf16.msra.mxu0 %v1683_v0  ;;  %1678 = vmatpush3.bf16.msra.mxu1 %v1683_v0  ;;  %v1687_v4 = vld [vmem:[%s2115_s0 + $0x80] sm:$0xff]   ;;  %v1689_v7 = vld [vmem:[%s2115_s0 + $0x88] sm:$0xff]   ;;  %v1691_v9 = vld [vmem:[%s2115_s0 + $0x90] sm:$0xff]  }
   0x4   :  { %1607 = vmatprep.subr.bf16.mxu0 %v1684_v1  ;;  %1676 = vmatprep.subr.bf16.mxu1 %v1684_v1  ;;  %v1692_v10 = vld [vmem:[%s2115_s0 + $0x18] sm:$0xff]   ;;  %v1694_v12 = vld [vmem:[%s2115_s0 + $0x20] sm:$0xff]   ;;  %v1696_v14 = vld [vmem:[%s2115_s0 + $0x28] sm:$0xff]  }
   0x5   :  { %1611 = vmatprep.mubr.msk.bf16.mxu0 %vm262_vm0, %v1686_v3  ;;  %1643 = vmatprep.mubr.msk.bf16.mxu1 %vm262_vm0, %v1687_v4  ;;  %v1693_v11 = vld [vmem:[%s2115_s0 + $0x98] sm:$0xff]   ;;  %v1695_v13 = vld [vmem:[%s2115_s0 + $0xa0] sm:$0xff]   ;;  %v1697_v15 = vld [vmem:[%s2115_s0 + $0xa8] sm:$0xff]  }
   0x6   :  { %v1698_v16 = vld [vmem:[%s2115_s0 + $0x30] sm:$0xff]   ;;  %v1700_v18 = vld [vmem:[%s2115_s0 + $0x38] sm:$0xff]   ;;  %v1702_v20 = vld [vmem:[%s2115_s0 + $0x40] sm:$0xff]  }
   0x7   :  { %1608 = vmatpush3.bf16.msra.mxu0 %v1684_v1  ;;  %1679 = vmatpush3.bf16.msra.mxu1 %v1684_v1  ;;  %v1699_v17 = vld [vmem:[%s2115_s0 + $0xb0] sm:$0xff]   ;;  %v1701_v19 = vld [vmem:[%s2115_s0 + $0xb8] sm:$0xff]   ;;  %v1703_v21 = vld [vmem:[%s2115_s0 + $0xc0] sm:$0xff]  }
   0x8   :  { %1681 = vmatprep.subr.msk.bf16.mxu0 %vm359_vm1, %v1685_v2  ;;  %1682 = vmatprep.subr.msk.bf16.mxu1 %vm359_vm1, %v1685_v2  ;;  %v1704_v22 = vld [vmem:[%s2115_s0 + $0x48] sm:$0xff]   ;;  %v1706_v24 = vld [vmem:[%s2115_s0 + $0x50] sm:$0xff]   ;;  %v1708_v26 = vld [vmem:[%s2115_s0 + $0x58] sm:$0xff]  }
   0x9   :  { %v1705_v23 = vld [vmem:[%s2115_s0 + $0xc8] sm:$0xff]   ;;  %v1707_v25 = vld [vmem:[%s2115_s0 + $0xd0] sm:$0xff]   ;;  %v1709_v27 = vld [vmem:[%s2115_s0 + $0xd8] sm:$0xff]  }
   0xa   :  { %v1710_v28 = vld [vmem:[%s2115_s0 + $0x60] sm:$0xff]   ;;  %v1712_v30 = vld [vmem:[%s2115_s0 + $0x68] sm:$0xff]   ;;  %v1714_v32 = vld [vmem:[%s2115_s0 + $0x70] sm:$0xff]  }
   0xb   :  { %1610 = vmatpush3.bf16.msra.mxu0 %v361_v5  ;;  %1680 = vmatpush3.bf16.msra.mxu1 %v361_v5  ;;  %v1711_v29 = vld [vmem:[%s2115_s0 + $0xe0] sm:$0xff]   ;;  %v1713_v31 = vld [vmem:[%s2115_s0 + $0xe8] sm:$0xff]   ;;  %v1715_v33 = vld [vmem:[%s2115_s0 + $0xf0] sm:$0xff]  }
   0xc   :  { %v1716_v34 = vld [vmem:[%s2115_s0 + $0x78] sm:$0xff]   ;;  %v1883_v36 = vld [vmem:[%s2116_s2] ss:$0 sm:$0xff] }
   0xd   :  { %v1717_v35 = vld [vmem:[%s2115_s0 + $0xf8] sm:$0xff]   ;;  %v1888_v38 = vld [vmem:[%s2117_s3] ss:$0 sm:$0xff] }
   0xe   :  { %1612 = vmatmul.mubr.msk.bf16.vlgmr.msra.gmra.mrb[0].mxu0 %vm262_vm0, %v1688_v6  ;;  %1644 = vmatmul.mubr.msk.bf16.vlgmr.msra.gmra.mrb[0].mxu1 %vm262_vm0, %v1689_v7 }
   0xf   :  { %1615 = vmatprep.mubr.msk.bf16.mxu0 %vm262_vm0, %v1690_v8  ;;  %1647 = vmatprep.mubr.msk.bf16.mxu1 %vm262_vm0, %v1691_v9 }
  0x16   :  { %1616 = vmatmul.mubr.msk.bf16.gmra.mrb[4].mxu0 %vm262_vm0, %v1692_v10  ;;  %1648 = vmatmul.mubr.msk.bf16.gmra.mrb[4].mxu1 %vm262_vm0, %v1693_v11 }
  0x17   :  { %1619 = vmatprep.mubr.msk.bf16.mxu0 %vm262_vm0, %v1694_v12  ;;  %1651 = vmatprep.mubr.msk.bf16.mxu1 %vm262_vm0, %v1695_v13 }
  0x1e   :  { %1620 = vmatmul.mubr.msk.bf16.gmra.mrb[8].mxu0 %vm262_vm0, %v1696_v14  ;;  %1652 = vmatmul.mubr.msk.bf16.gmra.mrb[8].mxu1 %vm262_vm0, %v1697_v15 }
  0x1f   :  { %1623 = vmatprep.mubr.msk.bf16.mxu0 %vm262_vm0, %v1698_v16  ;;  %1655 = vmatprep.mubr.msk.bf16.mxu1 %vm262_vm0, %v1699_v17 }
  0x26   :  { %1624 = vmatmul.mubr.msk.bf16.gmra.mrb[12].mxu0 %vm262_vm0, %v1700_v18  ;;  %1656 = vmatmul.mubr.msk.bf16.gmra.mrb[12].mxu1 %vm262_vm0, %v1701_v19 }
  0x27   :  { %1627 = vmatprep.mubr.msk.bf16.mxu0 %vm262_vm0, %v1702_v20  ;;  %1659 = vmatprep.mubr.msk.bf16.mxu1 %vm262_vm0, %v1703_v21 }
  0x2e   :  { %1628 = vmatmul.mubr.msk.bf16.gmra.mrb[16].mxu0 %vm262_vm0, %v1704_v22  ;;  %1660 = vmatmul.mubr.msk.bf16.gmra.mrb[16].mxu1 %vm262_vm0, %v1705_v23 }
  0x2f   :  { %1631 = vmatprep.mubr.msk.bf16.mxu0 %vm262_vm0, %v1706_v24  ;;  %1663 = vmatprep.mubr.msk.bf16.mxu1 %vm262_vm0, %v1707_v25 }
  0x36   :  { %1632 = vmatmul.mubr.msk.bf16.gmra.mrb[20].mxu0 %vm262_vm0, %v1708_v26  ;;  %1664 = vmatmul.mubr.msk.bf16.gmra.mrb[20].mxu1 %vm262_vm0, %v1709_v27 }
  0x37   :  { %1635 = vmatprep.mubr.msk.bf16.mxu0 %vm262_vm0, %v1710_v28  ;;  %1667 = vmatprep.mubr.msk.bf16.mxu1 %vm262_vm0, %v1711_v29 }
  0x3e   :  { %1636 = vmatmul.mubr.msk.bf16.gmra.mrb[24].mxu0 %vm262_vm0, %v1712_v30  ;;  %1668 = vmatmul.mubr.msk.bf16.gmra.mrb[24].mxu1 %vm262_vm0, %v1713_v31 }
  0x3f   :  { %1639 = vmatprep.mubr.msk.bf16.mxu0 %vm262_vm0, %v1714_v32  ;;  %1671 = vmatprep.mubr.msk.bf16.mxu1 %vm262_vm0, %v1715_v33 }
  0x46   :  { %1640 = vmatmul.mubr.msk.bf16.gmra.mrb[28].mxu0 %vm262_vm0, %v1716_v34  ;;  %1672 = vmatmul.mubr.msk.bf16.gmra.mrb[28].mxu1 %vm262_vm0, %v1717_v35 }
  0xe1   :  { %v1613_v37 = vpop.f32.mrb[0].mxu0  ;;  %v1645_v39 = vpop.f32.mrb[0].mxu1 }
  0xe2   :  { %v661_v40 = vmul.f32 %v1613_v37, %v1883_v36  ;;  %v693_v41 = vmul.f32 %v1645_v39, %v1883_v36  ;;  %v397_v42 = vpop.f32.mrb[1].mxu0  ;;  %v525_v43 = vpop.f32.mrb[1].mxu1 }
  0xe3   :  { %v659_v44 = vmul.f32 %v1883_v36, %v397_v42  ;;  %v691_v45 = vmul.f32 %v1883_v36, %v525_v43  ;;  %v1614_v46 = vpop.f32.mrb[2].mxu0  ;;  %v1646_v47 = vpop.f32.mrb[2].mxu1 }
  0xe4   :  { %v732_v48 = vadd.f32 %v1888_v38, %v661_v40  ;;  %v764_v49 = vadd.f32 %v1888_v38, %v693_v41  ;;  %v662_v50 = vmul.f32 %v1614_v46, %v1883_v36  ;;  %v694_v51 = vmul.f32 %v1646_v47, %v1883_v36  ;;  %v400_v52 = vpop.f32.mrb[3].mxu0  ;;  %v528_v53 = vpop.f32.mrb[3].mxu1 }
  0xe5   :  { %v730_v54 = vadd.f32 %v1888_v38, %v659_v44  ;;  %v762_v55 = vadd.f32 %v1888_v38, %v691_v45  ;;  %v660_v56 = vmul.f32 %v1883_v36, %v400_v52  ;;  %v692_v57 = vmul.f32 %v1883_v36, %v528_v53 }
  0xe6   :  { %v733_v58 = vadd.f32 %v1888_v38, %v662_v50  ;;  %v765_v59 = vadd.f32 %v1888_v38, %v694_v51  ;;  %v796_v62 = vmax.f32 %v732_v48, 0.0  ;;  %v828_v63 = vmax.f32 %v764_v49, 0.0 }
  0xe7   :  { %v731_v60 = vadd.f32 %v1888_v38, %v660_v56  ;;  %v763_v61 = vadd.f32 %v1888_v38, %v692_v57  ;;  %v794_v2 = vmax.f32 %v730_v54, 0.0  ;;  %v826_v3 = vmax.f32 %v762_v55, 0.0 }
  0xe8   :  { %v797_v0 = vmax.f32 %v733_v58, 0.0  ;;  %v829_v1 = vmax.f32 %v765_v59, 0.0 }
  0xe9   :  { %v795_v4 = vmax.f32 %v731_v60, 0.0  ;;  %v827_v5 = vmax.f32 %v763_v61, 0.0  ;;  %v1617_v6 = vpop.f32.mrb[4].mxu0  ;;  %v1649_v7 = vpop.f32.mrb[4].mxu1 }
  0xea   :  { %v1387_v8 = vpack.c.bf16 %v797_v0, %v796_v62  ;;  %v1467_v9 = vpack.c.bf16 %v829_v1, %v828_v63  ;;  %v665_v10 = vmul.f32 %v1617_v6, %v1883_v36  ;;  %v697_v11 = vmul.f32 %v1649_v7, %v1883_v36  ;;  %v413_v12 = vpop.f32.mrb[5].mxu0  ;;  %v541_v13 = vpop.f32.mrb[5].mxu1 }
  0xeb   :  { %v1382_v14 = vpack.c.bf16 %v795_v4, %v794_v2  ;;  %v1462_v15 = vpack.c.bf16 %v827_v5, %v826_v3  ;;  %v663_v16 = vmul.f32 %v1883_v36, %v413_v12  ;;  %v695_v17 = vmul.f32 %v1883_v36, %v541_v13  ;;  %v1618_v18 = vpop.f32.mrb[6].mxu0  ;;  %v1650_v19 = vpop.f32.mrb[6].mxu1 }
  0xec   :  { %1539 = vst [vmem:[%s2118_s4 + $0x8] sm:$0xff] %v1387_v8   ;;  %1555 = vst [vmem:[%s2118_s4 + $0x88] sm:$0xff] %v1467_v9   ;;  %v736_v20 = vadd.f32 %v1888_v38, %v665_v10  ;;  %v768_v21 = vadd.f32 %v1888_v38, %v697_v11  ;;  %v666_v22 = vmul.f32 %v1618_v18, %v1883_v36  ;;  %v416_v24 = vpop.f32.mrb[7].mxu0  ;;  %v544_v25 = vpop.f32.mrb[7].mxu1 }
  0xed   :  { %v698_v23 = vmul.f32 %v1650_v19, %v1883_v36  ;;  %1383 = vst [vmem:[%s2118_s4] sm:$0xff] %v1382_v14   ;;  %1554 = vst [vmem:[%s2118_s4 + $0x80] sm:$0xff] %v1462_v15   ;;  %v734_v26 = vadd.f32 %v1888_v38, %v663_v16  ;;  %v766_v27 = vadd.f32 %v1888_v38, %v695_v17 }
  0xee   :  { %v664_v28 = vmul.f32 %v1883_v36, %v416_v24  ;;  %v696_v29 = vmul.f32 %v1883_v36, %v544_v25  ;;  %v737_v30 = vadd.f32 %v1888_v38, %v666_v22  ;;  %v800_v34 = vmax.f32 %v736_v20, 0.0 }
  0xef   :  { %v769_v31 = vadd.f32 %v1888_v38, %v698_v23  ;;  %v832_v35 = vmax.f32 %v768_v21, 0.0  ;;  %v798_v40 = vmax.f32 %v734_v26, 0.0  ;;  %v830_v41 = vmax.f32 %v766_v27, 0.0 }
  0xf0   :  { %v735_v32 = vadd.f32 %v1888_v38, %v664_v28  ;;  %v767_v33 = vadd.f32 %v1888_v38, %v696_v29  ;;  %v801_v37 = vmax.f32 %v737_v30, 0.0 }
  0xf1   :  { %v833_v39 = vmax.f32 %v769_v31, 0.0  ;;  %v1621_v44 = vpop.f32.mrb[8].mxu0  ;;  %v1653_v45 = vpop.f32.mrb[8].mxu1 }
  0xf2   :  { %v799_v42 = vmax.f32 %v735_v32, 0.0  ;;  %v831_v43 = vmax.f32 %v767_v33, 0.0  ;;  %v1397_v46 = vpack.c.bf16 %v801_v37, %v800_v34  ;;  %v669_v48 = vmul.f32 %v1621_v44, %v1883_v36  ;;  %v429_v50 = vpop.f32.mrb[9].mxu0  ;;  %v557_v51 = vpop.f32.mrb[9].mxu1 }
  0xf3   :  { %v1477_v47 = vpack.c.bf16 %v833_v39, %v832_v35  ;;  %v701_v49 = vmul.f32 %v1653_v45, %v1883_v36  ;;  %v667_v54 = vmul.f32 %v1883_v36, %v429_v50  ;;  %v699_v55 = vmul.f32 %v1883_v36, %v557_v51  ;;  %v1622_v56 = vpop.f32.mrb[10].mxu0  ;;  %v1654_v57 = vpop.f32.mrb[10].mxu1 }
  0xf4   :  { %v1392_v52 = vpack.c.bf16 %v799_v42, %v798_v40  ;;  %v1472_v53 = vpack.c.bf16 %v831_v43, %v830_v41  ;;  %1541 = vst [vmem:[%s2118_s4 + $0x18] sm:$0xff] %v1397_v46   ;;  %v740_v58 = vadd.f32 %v1888_v38, %v669_v48  ;;  %v670_v60 = vmul.f32 %v1622_v56, %v1883_v36  ;;  %v432_v62 = vpop.f32.mrb[11].mxu0  ;;  %v560_v63 = vpop.f32.mrb[11].mxu1 }
  0xf5   :  { %1557 = vst [vmem:[%s2118_s4 + $0x98] sm:$0xff] %v1477_v47   ;;  %v772_v59 = vadd.f32 %v1888_v38, %v701_v49  ;;  %v702_v61 = vmul.f32 %v1654_v57, %v1883_v36  ;;  %v738_v0 = vadd.f32 %v1888_v38, %v667_v54  ;;  %v770_v1 = vadd.f32 %v1888_v38, %v699_v55 }
  0xf6   :  { %1540 = vst [vmem:[%s2118_s4 + $0x10] sm:$0xff] %v1392_v52   ;;  %1556 = vst [vmem:[%s2118_s4 + $0x90] sm:$0xff] %v1472_v53   ;;  %v668_v2 = vmul.f32 %v1883_v36, %v432_v62  ;;  %v700_v3 = vmul.f32 %v1883_v36, %v560_v63  ;;  %v741_v4 = vadd.f32 %v1888_v38, %v670_v60  ;;  %v804_v8 = vmax.f32 %v740_v58, 0.0 }
  0xf7   :  { %v773_v5 = vadd.f32 %v1888_v38, %v702_v61  ;;  %v836_v9 = vmax.f32 %v772_v59, 0.0  ;;  %v802_v12 = vmax.f32 %v738_v0, 0.0  ;;  %v834_v13 = vmax.f32 %v770_v1, 0.0 }
  0xf8   :  { %v739_v6 = vadd.f32 %v1888_v38, %v668_v2  ;;  %v771_v7 = vadd.f32 %v1888_v38, %v700_v3  ;;  %v805_v10 = vmax.f32 %v741_v4, 0.0 }
  0xf9   :  { %v837_v11 = vmax.f32 %v773_v5, 0.0  ;;  %v1625_v16 = vpop.f32.mrb[12].mxu0  ;;  %v1657_v17 = vpop.f32.mrb[12].mxu1 }
  0xfa   :  { %v803_v14 = vmax.f32 %v739_v6, 0.0  ;;  %v835_v15 = vmax.f32 %v771_v7, 0.0  ;;  %v1407_v18 = vpack.c.bf16 %v805_v10, %v804_v8  ;;  %v673_v20 = vmul.f32 %v1625_v16, %v1883_v36  ;;  %v445_v22 = vpop.f32.mrb[13].mxu0  ;;  %v573_v23 = vpop.f32.mrb[13].mxu1 }
  0xfb   :  { %v1487_v19 = vpack.c.bf16 %v837_v11, %v836_v9  ;;  %v705_v21 = vmul.f32 %v1657_v17, %v1883_v36  ;;  %v671_v26 = vmul.f32 %v1883_v36, %v445_v22  ;;  %v703_v27 = vmul.f32 %v1883_v36, %v573_v23  ;;  %v1626_v28 = vpop.f32.mrb[14].mxu0  ;;  %v1658_v29 = vpop.f32.mrb[14].mxu1 }
  0xfc   :  { %v1402_v24 = vpack.c.bf16 %v803_v14, %v802_v12  ;;  %v1482_v25 = vpack.c.bf16 %v835_v15, %v834_v13  ;;  %1543 = vst [vmem:[%s2118_s4 + $0x28] sm:$0xff] %v1407_v18   ;;  %v744_v30 = vadd.f32 %v1888_v38, %v673_v20  ;;  %v674_v32 = vmul.f32 %v1626_v28, %v1883_v36  ;;  %v448_v34 = vpop.f32.mrb[15].mxu0  ;;  %v576_v35 = vpop.f32.mrb[15].mxu1 }
  0xfd   :  { %1559 = vst [vmem:[%s2118_s4 + $0xa8] sm:$0xff] %v1487_v19   ;;  %v776_v31 = vadd.f32 %v1888_v38, %v705_v21  ;;  %v706_v33 = vmul.f32 %v1658_v29, %v1883_v36  ;;  %v742_v37 = vadd.f32 %v1888_v38, %v671_v26  ;;  %v774_v39 = vadd.f32 %v1888_v38, %v703_v27 }
  0xfe   :  { %1542 = vst [vmem:[%s2118_s4 + $0x20] sm:$0xff] %v1402_v24   ;;  %1558 = vst [vmem:[%s2118_s4 + $0xa0] sm:$0xff] %v1482_v25   ;;  %v672_v40 = vmul.f32 %v1883_v36, %v448_v34  ;;  %v704_v41 = vmul.f32 %v1883_v36, %v576_v35  ;;  %v745_v42 = vadd.f32 %v1888_v38, %v674_v32  ;;  %v808_v46 = vmax.f32 %v744_v30, 0.0 }
  0xff   :  { %v777_v43 = vadd.f32 %v1888_v38, %v706_v33  ;;  %v840_v47 = vmax.f32 %v776_v31, 0.0  ;;  %v806_v50 = vmax.f32 %v742_v37, 0.0  ;;  %v838_v51 = vmax.f32 %v774_v39, 0.0 }
 0x100   :  { %v743_v44 = vadd.f32 %v1888_v38, %v672_v40  ;;  %v775_v45 = vadd.f32 %v1888_v38, %v704_v41  ;;  %v809_v48 = vmax.f32 %v745_v42, 0.0 }
 0x101   :  { %v841_v49 = vmax.f32 %v777_v43, 0.0  ;;  %v1629_v54 = vpop.f32.mrb[16].mxu0  ;;  %v1661_v55 = vpop.f32.mrb[16].mxu1 }
 0x102   :  { %v807_v52 = vmax.f32 %v743_v44, 0.0  ;;  %v839_v53 = vmax.f32 %v775_v45, 0.0  ;;  %v1417_v56 = vpack.c.bf16 %v809_v48, %v808_v46  ;;  %v677_v58 = vmul.f32 %v1629_v54, %v1883_v36  ;;  %v461_v60 = vpop.f32.mrb[17].mxu0  ;;  %v589_v61 = vpop.f32.mrb[17].mxu1 }
 0x103   :  { %v1497_v57 = vpack.c.bf16 %v841_v49, %v840_v47  ;;  %v709_v59 = vmul.f32 %v1661_v55, %v1883_v36  ;;  %v675_v0 = vmul.f32 %v1883_v36, %v461_v60  ;;  %v707_v1 = vmul.f32 %v1883_v36, %v589_v61  ;;  %v1630_v2 = vpop.f32.mrb[18].mxu0  ;;  %v1662_v3 = vpop.f32.mrb[18].mxu1 }
 0x104   :  { %v1412_v62 = vpack.c.bf16 %v807_v52, %v806_v50  ;;  %v1492_v63 = vpack.c.bf16 %v839_v53, %v838_v51  ;;  %1545 = vst [vmem:[%s2118_s4 + $0x38] sm:$0xff] %v1417_v56   ;;  %v748_v4 = vadd.f32 %v1888_v38, %v677_v58  ;;  %v678_v6 = vmul.f32 %v1630_v2, %v1883_v36  ;;  %v464_v8 = vpop.f32.mrb[19].mxu0  ;;  %v592_v9 = vpop.f32.mrb[19].mxu1 }
 0x105   :  { %1561 = vst [vmem:[%s2118_s4 + $0xb8] sm:$0xff] %v1497_v57   ;;  %v780_v5 = vadd.f32 %v1888_v38, %v709_v59  ;;  %v710_v7 = vmul.f32 %v1662_v3, %v1883_v36  ;;  %v746_v10 = vadd.f32 %v1888_v38, %v675_v0  ;;  %v778_v11 = vadd.f32 %v1888_v38, %v707_v1 }
 0x106   :  { %1544 = vst [vmem:[%s2118_s4 + $0x30] sm:$0xff] %v1412_v62   ;;  %1560 = vst [vmem:[%s2118_s4 + $0xb0] sm:$0xff] %v1492_v63   ;;  %v676_v12 = vmul.f32 %v1883_v36, %v464_v8  ;;  %v708_v13 = vmul.f32 %v1883_v36, %v592_v9  ;;  %v749_v14 = vadd.f32 %v1888_v38, %v678_v6  ;;  %v812_v18 = vmax.f32 %v748_v4, 0.0 }
 0x107   :  { %v781_v15 = vadd.f32 %v1888_v38, %v710_v7  ;;  %v844_v19 = vmax.f32 %v780_v5, 0.0  ;;  %v810_v22 = vmax.f32 %v746_v10, 0.0  ;;  %v842_v23 = vmax.f32 %v778_v11, 0.0 }
 0x108   :  { %v747_v16 = vadd.f32 %v1888_v38, %v676_v12  ;;  %v779_v17 = vadd.f32 %v1888_v38, %v708_v13  ;;  %v813_v20 = vmax.f32 %v749_v14, 0.0 }
 0x109   :  { %v845_v21 = vmax.f32 %v781_v15, 0.0  ;;  %v1633_v26 = vpop.f32.mrb[20].mxu0  ;;  %v1665_v27 = vpop.f32.mrb[20].mxu1 }
 0x10a   :  { %v811_v24 = vmax.f32 %v747_v16, 0.0  ;;  %v843_v25 = vmax.f32 %v779_v17, 0.0  ;;  %v1427_v28 = vpack.c.bf16 %v813_v20, %v812_v18  ;;  %v681_v30 = vmul.f32 %v1633_v26, %v1883_v36  ;;  %v477_v32 = vpop.f32.mrb[21].mxu0  ;;  %v605_v33 = vpop.f32.mrb[21].mxu1 }
 0x10b   :  { %v1507_v29 = vpack.c.bf16 %v845_v21, %v844_v19  ;;  %v713_v31 = vmul.f32 %v1665_v27, %v1883_v36  ;;  %v679_v37 = vmul.f32 %v1883_v36, %v477_v32  ;;  %v711_v39 = vmul.f32 %v1883_v36, %v605_v33  ;;  %v1634_v40 = vpop.f32.mrb[22].mxu0  ;;  %v1666_v41 = vpop.f32.mrb[22].mxu1 }
 0x10c   :  { %v1422_v34 = vpack.c.bf16 %v811_v24, %v810_v22  ;;  %v1502_v35 = vpack.c.bf16 %v843_v25, %v842_v23  ;;  %1547 = vst [vmem:[%s2118_s4 + $0x48] sm:$0xff] %v1427_v28   ;;  %v752_v42 = vadd.f32 %v1888_v38, %v681_v30  ;;  %v682_v44 = vmul.f32 %v1634_v40, %v1883_v36  ;;  %v480_v46 = vpop.f32.mrb[23].mxu0  ;;  %v608_v47 = vpop.f32.mrb[23].mxu1 }
 0x10d   :  { %1563 = vst [vmem:[%s2118_s4 + $0xc8] sm:$0xff] %v1507_v29   ;;  %v784_v43 = vadd.f32 %v1888_v38, %v713_v31  ;;  %v714_v45 = vmul.f32 %v1666_v41, %v1883_v36  ;;  %v750_v48 = vadd.f32 %v1888_v38, %v679_v37  ;;  %v782_v49 = vadd.f32 %v1888_v38, %v711_v39 }
 0x10e   :  { %1546 = vst [vmem:[%s2118_s4 + $0x40] sm:$0xff] %v1422_v34   ;;  %1562 = vst [vmem:[%s2118_s4 + $0xc0] sm:$0xff] %v1502_v35   ;;  %v680_v50 = vmul.f32 %v1883_v36, %v480_v46  ;;  %v712_v51 = vmul.f32 %v1883_v36, %v608_v47  ;;  %v753_v52 = vadd.f32 %v1888_v38, %v682_v44  ;;  %v816_v56 = vmax.f32 %v752_v42, 0.0 }
 0x10f   :  { %v785_v53 = vadd.f32 %v1888_v38, %v714_v45  ;;  %v848_v57 = vmax.f32 %v784_v43, 0.0  ;;  %v814_v60 = vmax.f32 %v750_v48, 0.0  ;;  %v846_v61 = vmax.f32 %v782_v49, 0.0 }
 0x110   :  { %v751_v54 = vadd.f32 %v1888_v38, %v680_v50  ;;  %v783_v55 = vadd.f32 %v1888_v38, %v712_v51  ;;  %v817_v58 = vmax.f32 %v753_v52, 0.0 }
 0x111   :  { %v849_v59 = vmax.f32 %v785_v53, 0.0  ;;  %v1637_v0 = vpop.f32.mrb[24].mxu0  ;;  %v1669_v1 = vpop.f32.mrb[24].mxu1 }
 0x112   :  { %v815_v62 = vmax.f32 %v751_v54, 0.0  ;;  %v847_v63 = vmax.f32 %v783_v55, 0.0  ;;  %v1437_v2 = vpack.c.bf16 %v817_v58, %v816_v56  ;;  %v685_v4 = vmul.f32 %v1637_v0, %v1883_v36  ;;  %v493_v6 = vpop.f32.mrb[25].mxu0  ;;  %v621_v7 = vpop.f32.mrb[25].mxu1 }
 0x113   :  { %v1517_v3 = vpack.c.bf16 %v849_v59, %v848_v57  ;;  %v717_v5 = vmul.f32 %v1669_v1, %v1883_v36  ;;  %v683_v10 = vmul.f32 %v1883_v36, %v493_v6  ;;  %v715_v11 = vmul.f32 %v1883_v36, %v621_v7  ;;  %v1638_v12 = vpop.f32.mrb[26].mxu0  ;;  %v1670_v13 = vpop.f32.mrb[26].mxu1 }
 0x114   :  { %v1432_v8 = vpack.c.bf16 %v815_v62, %v814_v60  ;;  %v1512_v9 = vpack.c.bf16 %v847_v63, %v846_v61  ;;  %1549 = vst [vmem:[%s2118_s4 + $0x58] sm:$0xff] %v1437_v2   ;;  %v756_v14 = vadd.f32 %v1888_v38, %v685_v4  ;;  %v686_v16 = vmul.f32 %v1638_v12, %v1883_v36  ;;  %v496_v18 = vpop.f32.mrb[27].mxu0  ;;  %v624_v19 = vpop.f32.mrb[27].mxu1 }
 0x115   :  { %1565 = vst [vmem:[%s2118_s4 + $0xd8] sm:$0xff] %v1517_v3   ;;  %v788_v15 = vadd.f32 %v1888_v38, %v717_v5  ;;  %v718_v17 = vmul.f32 %v1670_v13, %v1883_v36  ;;  %v754_v20 = vadd.f32 %v1888_v38, %v683_v10  ;;  %v786_v21 = vadd.f32 %v1888_v38, %v715_v11 }
 0x116   :  { %1548 = vst [vmem:[%s2118_s4 + $0x50] sm:$0xff] %v1432_v8   ;;  %1564 = vst [vmem:[%s2118_s4 + $0xd0] sm:$0xff] %v1512_v9   ;;  %v684_v22 = vmul.f32 %v1883_v36, %v496_v18  ;;  %v716_v23 = vmul.f32 %v1883_v36, %v624_v19  ;;  %v757_v24 = vadd.f32 %v1888_v38, %v686_v16  ;;  %v820_v28 = vmax.f32 %v756_v14, 0.0 }
 0x117   :  { %v789_v25 = vadd.f32 %v1888_v38, %v718_v17  ;;  %v852_v29 = vmax.f32 %v788_v15, 0.0  ;;  %v818_v32 = vmax.f32 %v754_v20, 0.0  ;;  %v850_v33 = vmax.f32 %v786_v21, 0.0 }
 0x118   :  { %v755_v26 = vadd.f32 %v1888_v38, %v684_v22  ;;  %v787_v27 = vadd.f32 %v1888_v38, %v716_v23  ;;  %v821_v30 = vmax.f32 %v757_v24, 0.0 }
 0x119   :  { %v853_v31 = vmax.f32 %v789_v25, 0.0  ;;  %v1641_v37 = vpop.f32.mrb[28].mxu0  ;;  %v1673_v39 = vpop.f32.mrb[28].mxu1 }
 0x11a   :  { %v819_v34 = vmax.f32 %v755_v26, 0.0  ;;  %v851_v35 = vmax.f32 %v787_v27, 0.0  ;;  %v1447_v40 = vpack.c.bf16 %v821_v30, %v820_v28  ;;  %v689_v42 = vmul.f32 %v1641_v37, %v1883_v36  ;;  %v509_v44 = vpop.f32.mrb[29].mxu0  ;;  %v637_v45 = vpop.f32.mrb[29].mxu1 }
 0x11b   :  { %v1527_v41 = vpack.c.bf16 %v853_v31, %v852_v29  ;;  %v721_v43 = vmul.f32 %v1673_v39, %v1883_v36  ;;  %v687_v48 = vmul.f32 %v1883_v36, %v509_v44  ;;  %v719_v49 = vmul.f32 %v1883_v36, %v637_v45  ;;  %v1642_v50 = vpop.f32.mrb[30].mxu0  ;;  %v1674_v51 = vpop.f32.mrb[30].mxu1 }
 0x11c   :  { %v1442_v46 = vpack.c.bf16 %v819_v34, %v818_v32  ;;  %v1522_v47 = vpack.c.bf16 %v851_v35, %v850_v33  ;;  %1551 = vst [vmem:[%s2118_s4 + $0x68] sm:$0xff] %v1447_v40   ;;  %v760_v52 = vadd.f32 %v1888_v38, %v689_v42  ;;  %v690_v54 = vmul.f32 %v1642_v50, %v1883_v36  ;;  %v512_v56 = vpop.f32.mrb[31].mxu0  ;;  %v640_v57 = vpop.f32.mrb[31].mxu1 }
 0x11d   :  { %1567 = vst [vmem:[%s2118_s4 + $0xe8] sm:$0xff] %v1527_v41   ;;  %v792_v53 = vadd.f32 %v1888_v38, %v721_v43  ;;  %v722_v55 = vmul.f32 %v1674_v51, %v1883_v36  ;;  %v758_v58 = vadd.f32 %v1888_v38, %v687_v48  ;;  %v790_v59 = vadd.f32 %v1888_v38, %v719_v49 }
 0x11e   :  { %1550 = vst [vmem:[%s2118_s4 + $0x60] sm:$0xff] %v1442_v46   ;;  %1566 = vst [vmem:[%s2118_s4 + $0xe0] sm:$0xff] %v1522_v47   ;;  %v688_v60 = vmul.f32 %v1883_v36, %v512_v56  ;;  %v720_v61 = vmul.f32 %v1883_v36, %v640_v57  ;;  %v761_v62 = vadd.f32 %v1888_v38, %v690_v54  ;;  %v824_v2 = vmax.f32 %v760_v52, 0.0 }
 0x11f   :  { %v793_v63 = vadd.f32 %v1888_v38, %v722_v55  ;;  %v856_v3 = vmax.f32 %v792_v53, 0.0  ;;  %v822_v6 = vmax.f32 %v758_v58, 0.0  ;;  %v854_v7 = vmax.f32 %v790_v59, 0.0 }
 0x120   :  { %v759_v0 = vadd.f32 %v1888_v38, %v688_v60  ;;  %v791_v1 = vadd.f32 %v1888_v38, %v720_v61  ;;  %v825_v4 = vmax.f32 %v761_v62, 0.0 }
 0x121   :  { %v857_v5 = vmax.f32 %v793_v63, 0.0 }
 0x122   :  { %v823_v8 = vmax.f32 %v759_v0, 0.0  ;;  %v855_v9 = vmax.f32 %v791_v1, 0.0  ;;  %v1457_v10 = vpack.c.bf16 %v825_v4, %v824_v2 }
 0x123   :  { %v1537_v11 = vpack.c.bf16 %v857_v5, %v856_v3 }
 0x124   :  { %v1452_v12 = vpack.c.bf16 %v823_v8, %v822_v6  ;;  %v1532_v36 = vpack.c.bf16 %v855_v9, %v854_v7  ;;  %1553 = vst [vmem:[%s2118_s4 + $0x78] sm:$0xff] %v1457_v10  }
 0x125   :  { %1569 = vst [vmem:[%s2118_s4 + $0xf8] sm:$0xff] %v1537_v11  }
 0x126   :  { %1552 = vst [vmem:[%s2118_s4 + $0x70] sm:$0xff] %v1452_v12   ;;  %1568 = vst [vmem:[%s2118_s4 + $0xf0] sm:$0xff] %v1532_v36  }

</bundles_post_ra>
